<compile_context>
chip_gen: v7x
topology: tpu7x:2x2x1
jax: 0.10.0
libtpu: 0.0.40
codegen_flags: <defaults>
</compile_context>

<pallas_src>
import jax
import jax.numpy as jnp
from jax.experimental import pallas as pl
from jax.experimental.pallas import tpu as pltpu


# ---------------------------------------------------------------------------
# tiling helpers
# ---------------------------------------------------------------------------
_TB_PREF = 256    # batch tile (sublane axis)
_TV_PREF = 2048   # vocab tile (lane axis)


def _round_up(x, m):
    return (x + m - 1) // m * m


def _choose_batch_tile(b):
    """bf16 packs 16 rows per sublane group -> align batch to 16."""
    bp = _round_up(max(b, 1), 16)
    if bp <= _TB_PREF:
        return bp, bp
    return _TB_PREF, _round_up(bp, _TB_PREF)


def _choose_vocab_tile(v):
    """Full-extent tile (no padding, no post-kernel slice) when V fits."""
    if v <= _TV_PREF:
        return v, v
    return _TV_PREF, _round_up(v, _TV_PREF)


# ---------------------------------------------------------------------------
# kernel: both Linear projections in one grid step
# ---------------------------------------------------------------------------
def _proj_kernel(xu_ref, xi_ref, wu_ref, wi_ref, bu_ref, bi_ref,
                 ou_ref, oi_ref):
    # x*: [tb, D] bf16   w*: [D, tv] bf16   b*: [1, tv] f32   o*: [tb, tv] bf16
    ou_ref[...] = (
        jnp.dot(xu_ref[...], wu_ref[...], preferred_element_type=jnp.float32)
        + bu_ref[...]
    ).astype(ou_ref.dtype)
    oi_ref[...] = (
        jnp.dot(xi_ref[...], wi_ref[...], preferred_element_type=jnp.float32)
        + bi_ref[...]
    ).astype(oi_ref.dtype)


# ---------------------------------------------------------------------------
# forward
# ---------------------------------------------------------------------------
def attr_network_forward(pos_tag_input, neg_tag_input, rating,
                         user_ids, item_ids, params):
    # Embedding lookups: pure gathers, stay in JAX glue.
    user_x = params["user_emb"][user_ids]      # [B, D] f32
    user_h = params["H1"][user_ids]            # [B, 32] f32
    item_x = params["item_emb"][item_ids]      # [B, D] f32
    item_h = params["H2"][item_ids]            # [B, 32] f32

    V = params["vocab_size"]
    B, D = user_x.shape

    Wu_t = params["W_user_t"]                  # [D, Vp] bf16 (transposed)
    Wi_t = params["W_item_t"]                  # [D, Vp] bf16
    bu = params["b_user"]                      # [1, Vp] f32
    bi = params["b_item"]                      # [1, Vp] f32
    Vp = Wu_t.shape[1]

    tb, Bp = _choose_batch_tile(B)
    tv = Vp if Vp <= _TV_PREF else _TV_PREF
    pad_b = Bp - B

    xu = user_x.astype(jnp.bfloat16)
    xi = item_x.astype(jnp.bfloat16)
    if pad_b:
        xu = jnp.pad(xu, ((0, pad_b), (0, 0)))
        xi = jnp.pad(xi, ((0, pad_b), (0, 0)))

    # Vocab outer, batch INNER -> weight/bias block index unchanged across the
    # inner axis, so Pallas keeps the [D, tv] weight tiles VMEM-resident.
    grid = (Vp // tv, Bp // tb)

    x_spec = pl.BlockSpec((tb, D), lambda j, i: (i, 0))
    w_spec = pl.BlockSpec((D, tv), lambda j, i: (0, j))
    b_spec = pl.BlockSpec((1, tv), lambda j, i: (0, j))
    o_spec = pl.BlockSpec((tb, tv), lambda j, i: (i, j))

    bytes_accessed = (
        2 * D * Vp * 2                       # bf16 weights, read once each
        + 2 * Bp * D * 2 * (Vp // tv)        # bf16 x, re-read per vocab tile
        + 2 * Vp * 4                         # f32 biases
        + 2 * Bp * Vp * 2                    # bf16 outputs
    )

    user_attr_p, item_attr_p = pl.pallas_call(
        _proj_kernel,
        out_shape=(jax.ShapeDtypeStruct((Bp, Vp), jnp.bfloat16),
                   jax.ShapeDtypeStruct((Bp, Vp), jnp.bfloat16)),
        grid_spec=pltpu.PrefetchScalarGridSpec(
            num_scalar_prefetch=0,
            grid=grid,
            in_specs=[x_spec, x_spec, w_spec, w_spec, b_spec, b_spec],
            out_specs=[o_spec, o_spec],
        ),
        compiler_params=pltpu.CompilerParams(
            dimension_semantics=("parallel", "parallel"),
            # Footprint at tb=256, tv=2048 is ~5 MiB double-buffered; 32 MiB is
            # within every generation's scoped budget (16/32/32 MiB defaults,
            # v7x physical 64 MiB).  Raise toward 48-64 MiB on v5e/v6e only if
            # tiles are enlarged further.
            vmem_limit_bytes=32 * 1024 * 1024,
        ),
        cost_estimate=pl.CostEstimate(
            flops=2 * 2 * Bp * D * Vp,
            transcendentals=0,
            bytes_accessed=bytes_accessed,
        ),
    )(xu, xi, Wu_t, Wi_t, bu, bi)

    # Slice only when padding actually happened (never in the aligned case).
    if pad_b or Vp != V:
        user_attr_p = user_attr_p[:B, :V]
        item_attr_p = item_attr_p[:B, :V]

    # Rating path: ~B*64 FLOPs -> plain JAX glue (XLA fuses it); a separate
    # pallas_call is pure fixed overhead per the perf review.
    u2 = jnp.concatenate([user_x, user_h], axis=1)             # [B, D+32]
    i2 = jnp.concatenate([item_x, item_h], axis=1)             # [B, D+32]
    rating_l = jnp.sum(u2 * i2, axis=1) - rating               # [B]

    # Module returns the tag inputs untouched (user_attr_t / item_attr_t).
    return user_attr_p, pos_tag_input, item_attr_p, neg_tag_input, rating_l


# ---------------------------------------------------------------------------
# params
# ---------------------------------------------------------------------------
def init_params(key, vocab_size, user_num, item_num, emb_size):
    """Per f_init_weight: Linear weights + user/item embeddings ~ N(0, 0.01);
    Linear biases use PyTorch's default uniform(-1/sqrt(D), 1/sqrt(D)); H1/H2
    keep nn.Embedding's default N(0, 1).  Linear weights stored transposed
    ([D, Vp]) in bf16 (documented precision choice), biases f32."""
    ks = jax.random.split(key, 8)
    _, Vp = _choose_vocab_tile(vocab_size)
    pad_v = Vp - vocab_size

    Wu = 0.01 * jax.random.normal(ks[0], (vocab_size, emb_size), jnp.float32)
    Wi = 0.01 * jax.random.normal(ks[1], (vocab_size, emb_size), jnp.float32)
    bound = 1.0 / (emb_size ** 0.5)
    bu = jax.random.uniform(ks[2], (vocab_size,), jnp.float32, -bound, bound)
    bi = jax.random.uniform(ks[3], (vocab_size,), jnp.float32, -bound, bound)

    def pad_wt(w):    # [V, D] -> [D, Vp] bf16
        return jnp.pad(w.T, ((0, 0), (0, pad_v))).astype(jnp.bfloat16)

    def pad_bias(v):  # [V] -> [1, Vp] f32
        return jnp.pad(v, (0, pad_v))[None, :]

    return {
        "W_user_t": pad_wt(Wu),
        "W_item_t": pad_wt(Wi),
        "b_user": pad_bias(bu),
        "b_item": pad_bias(bi),
        "vocab_size": vocab_size,
        "user_emb": 0.01 * jax.random.normal(ks[4], (user_num, emb_size), jnp.float32),
        "item_emb": 0.01 * jax.random.normal(ks[5], (item_num, emb_size), jnp.float32),
        "H1": jax.random.normal(ks[6], (user_num, 32), jnp.float32),
        "H2": jax.random.normal(ks[7], (item_num, 32), jnp.float32),
    }


# ---------------------------------------------------------------------------
if __name__ == "__main__":
    # Small shapes consistent with the module (the forward requires
    # user_emb_size == item_emb_size == attr_emb_size).  V=1000 <= _TV_PREF so
    # the vocab runs at full extent (no padding / no post-kernel slice).
    VOCAB, USER_NUM, ITEM_NUM, EMB, B = 1000, 40, 60, 32, 16

    key = jax.random.PRNGKey(0)
    kp, k1, k2, k3, k4, k5 = jax.random.split(key, 6)

    params = init_params(kp, VOCAB, USER_NUM, ITEM_NUM, EMB)

    pos_tag_input = jax.random.uniform(k1, (B, VOCAB), jnp.float32)
    neg_tag_input = jax.random.uniform(k2, (B, VOCAB), jnp.float32)
    rating = jax.random.uniform(k3, (B,), jnp.float32)
    user_ids = jax.random.randint(k4, (B,), 0, USER_NUM)
    item_ids = jax.random.randint(k5, (B,), 0, ITEM_NUM)

    outs = attr_network_forward(pos_tag_input, neg_tag_input, rating,
                                user_ids, item_ids, params)
    outs = jax.block_until_ready(outs)

    # Reference in plain f32 JAX.  The kernel uses bf16 operands + bf16 output
    # store (f32 accumulation), so allow bf16-level tolerance on projections;
    # the rating path is pure f32.
    user_x = params["user_emb"][user_ids]
    item_x = params["item_emb"][item_ids]
    Wu = params["W_user_t"][:, :VOCAB].astype(jnp.float32)
    Wi = params["W_item_t"][:, :VOCAB].astype(jnp.float32)
    bu = params["b_user"][:, :VOCAB]
    bi = params["b_item"][:, :VOCAB]
    ref_user_p = user_x @ Wu + bu
    ref_item_p = item_x @ Wi + bi
    u2 = jnp.concatenate([user_x, params["H1"][user_ids]], axis=1)
    i2 = jnp.concatenate([item_x, params["H2"][item_ids]], axis=1)
    ref_rating_l = jnp.sum(u2 * i2, axis=1) - rating

    assert outs[0].shape == (B, VOCAB) and outs[2].shape == (B, VOCAB)
    assert outs[4].shape == (B,)
    assert jnp.allclose(outs[0].astype(jnp.float32), ref_user_p, atol=2e-3)
    assert jnp.allclose(outs[2].astype(jnp.float32), ref_item_p, atol=2e-3)
    assert jnp.allclose(outs[4], ref_rating_l, atol=1e-4)
    assert jnp.array_equal(outs[1], pos_tag_input)
    assert jnp.array_equal(outs[3], neg_tag_input)

    print("KERNEL_OK")
</pallas_src>

<mosaic_0001>
module attributes {stable_mosaic.version = 11 : i64} {
  func.func @_proj_kernel(%arg0: i32, %arg1: i32, %arg2: memref<16x32xbf16, #tpu.memory_space<vmem>>, %arg3: memref<16x32xbf16, #tpu.memory_space<vmem>>, %arg4: memref<32x1000xbf16, #tpu.memory_space<vmem>>, %arg5: memref<32x1000xbf16, #tpu.memory_space<vmem>>, %arg6: memref<1x1000xf32, #tpu.memory_space<vmem>>, %arg7: memref<1x1000xf32, #tpu.memory_space<vmem>>, %arg8: memref<16x1000xbf16, #tpu.memory_space<vmem>>, %arg9: memref<16x1000xbf16, #tpu.memory_space<vmem>>) attributes {dimension_semantics = [#tpu.dimension_semantics<parallel>, #tpu.dimension_semantics<parallel>], iteration_bounds = array<i64: 1, 1>, scalar_prefetch = 0 : i64, scratch_operands = 0 : i64, tpu.core_type = #tpu.core_type<tc>, window_params = [{transform_indices = @transform_0, window_bounds = array<i64: 16, 32>}, {transform_indices = @transform_1, window_bounds = array<i64: 16, 32>}, {transform_indices = @transform_2, window_bounds = array<i64: 32, 1000>}, {transform_indices = @transform_3, window_bounds = array<i64: 32, 1000>}, {transform_indices = @transform_4, window_bounds = array<i64: 1, 1000>}, {transform_indices = @transform_5, window_bounds = array<i64: 1, 1000>}, {transform_indices = @transform_6, window_bounds = array<i64: 16, 1000>}, {transform_indices = @transform_7, window_bounds = array<i64: 16, 1000>}]} {
    %c0 = arith.constant 0 : index
    %c0_0 = arith.constant 0 : index
    %0 = vector.load %arg2[%c0, %c0_0] : memref<16x32xbf16, #tpu.memory_space<vmem>>, vector<16x32xbf16>
    %c0_1 = arith.constant 0 : index
    %c0_2 = arith.constant 0 : index
    %1 = vector.load %arg4[%c0_1, %c0_2] : memref<32x1000xbf16, #tpu.memory_space<vmem>>, vector<32x1000xbf16>
    %cst = arith.constant dense<0.000000e+00> : vector<16x1000xf32>
    %2 = tpu.matmul %0, %1, %cst {dimension_numbers = #tpu.dot_dimension_numbers<[1], [0], [0], [1], [0, 0, 1, 1], [], []>} : vector<16x32xbf16>, vector<32x1000xbf16>, vector<16x1000xf32> -> vector<16x1000xf32>
    %c0_3 = arith.constant 0 : index
    %c0_4 = arith.constant 0 : index
    %3 = vector.load %arg6[%c0_3, %c0_4] : memref<1x1000xf32, #tpu.memory_space<vmem>>, vector<1x1000xf32>
    %4 = vector.broadcast %3 : vector<1x1000xf32> to vector<16x1000xf32>
    %5 = arith.addf %2, %4 : vector<16x1000xf32>
    %6 = arith.truncf %5 : vector<16x1000xf32> to vector<16x1000xbf16>
    %c0_5 = arith.constant 0 : index
    %c0_6 = arith.constant 0 : index
    %7 = vector.load %arg8[%c0_5, %c0_6] : memref<16x1000xbf16, #tpu.memory_space<vmem>>, vector<16x1000xbf16>
    tpu.vector_store %arg8[%c0_5, %c0_6], %6 {strides = array<i32>} : memref<16x1000xbf16, #tpu.memory_space<vmem>>, vector<16x1000xbf16>,
    %c0_7 = arith.constant 0 : index
    %c0_8 = arith.constant 0 : index
    %8 = vector.load %arg3[%c0_7, %c0_8] : memref<16x32xbf16, #tpu.memory_space<vmem>>, vector<16x32xbf16>
    %c0_9 = arith.constant 0 : index
    %c0_10 = arith.constant 0 : index
    %9 = vector.load %arg5[%c0_9, %c0_10] : memref<32x1000xbf16, #tpu.memory_space<vmem>>, vector<32x1000xbf16>
    %cst_11 = arith.constant dense<0.000000e+00> : vector<16x1000xf32>
    %10 = tpu.matmul %8, %9, %cst_11 {dimension_numbers = #tpu.dot_dimension_numbers<[1], [0], [0], [1], [0, 0, 1, 1], [], []>} : vector<16x32xbf16>, vector<32x1000xbf16>, vector<16x1000xf32> -> vector<16x1000xf32>
    %c0_12 = arith.constant 0 : index
    %c0_13 = arith.constant 0 : index
    %11 = vector.load %arg7[%c0_12, %c0_13] : memref<1x1000xf32, #tpu.memory_space<vmem>>, vector<1x1000xf32>
    %12 = vector.broadcast %11 : vector<1x1000xf32> to vector<16x1000xf32>
    %13 = arith.addf %10, %12 : vector<16x1000xf32>
    %14 = arith.truncf %13 : vector<16x1000xf32> to vector<16x1000xbf16>
    %c0_14 = arith.constant 0 : index
    %c0_15 = arith.constant 0 : index
    %15 = vector.load %arg9[%c0_14, %c0_15] : memref<16x1000xbf16, #tpu.memory_space<vmem>>, vector<16x1000xbf16>
    tpu.vector_store %arg9[%c0_14, %c0_15], %14 {strides = array<i32>} : memref<16x1000xbf16, #tpu.memory_space<vmem>>, vector<16x1000xbf16>,
    return
  }
  func.func @transform_0(%arg0: i32, %arg1: i32) -> (i32, i32) {
    %c0_i32 = arith.constant 0 : i32
    %c0_i32_0 = arith.constant 0 : i32
    return %arg1, %c0_i32 : i32, i32
  }
  func.func @transform_1(%arg0: i32, %arg1: i32) -> (i32, i32) {
    %c0_i32 = arith.constant 0 : i32
    %c0_i32_0 = arith.constant 0 : i32
    return %arg1, %c0_i32 : i32, i32
  }
  func.func @transform_2(%arg0: i32, %arg1: i32) -> (i32, i32) {
    %c0_i32 = arith.constant 0 : i32
    %c0_i32_0 = arith.constant 0 : i32
    return %c0_i32, %arg0 : i32, i32
  }
  func.func @transform_3(%arg0: i32, %arg1: i32) -> (i32, i32) {
    %c0_i32 = arith.constant 0 : i32
    %c0_i32_0 = arith.constant 0 : i32
    return %c0_i32, %arg0 : i32, i32
  }
  func.func @transform_4(%arg0: i32, %arg1: i32) -> (i32, i32) {
    %c0_i32 = arith.constant 0 : i32
    %c0_i32_0 = arith.constant 0 : i32
    return %c0_i32, %arg0 : i32, i32
  }
  func.func @transform_5(%arg0: i32, %arg1: i32) -> (i32, i32) {
    %c0_i32 = arith.constant 0 : i32
    %c0_i32_0 = arith.constant 0 : i32
    return %c0_i32, %arg0 : i32, i32
  }
  func.func @transform_6(%arg0: i32, %arg1: i32) -> (i32, i32) {
    %c0_i32 = arith.constant 0 : i32
    return %arg1, %arg0 : i32, i32
  }
  func.func @transform_7(%arg0: i32, %arg1: i32) -> (i32, i32) {
    %c0_i32 = arith.constant 0 : i32
    return %arg1, %arg0 : i32, i32
  }
}

</mosaic_0001>

<bundles_post_ra>
// kernel: tpu_custom_call.1
= control target key start
LH: loop header
LB: loop body
LE: loop exit
PB: predicated region body
PF: predicated region fallthrough
CT: control target
= control target key end

     0   :  { %13 = vsyncpa [#allocation3], 0  ;;  %s1331_s0 = inlined_call_operand.hbm [shape: bf16[16,32], index: 0, kind: input, shape index: {}]   ;;  %s1332_s1 = inlined_call_operand.hbm [shape: bf16[16,32], index: 1, kind: input, shape index: {}]   ;;  %s1333_s2 = inlined_call_operand.hbm [shape: bf16[32,1000], index: 2, kind: input, shape index: {}]   ;;  %s1334_s3 = inlined_call_operand.hbm [shape: bf16[32,1000], index: 3, kind: input, shape index: {}]   ;;  %s1335_s4 = inlined_call_operand.vmem [shape: f32[1,1000], index: 4, kind: input, shape index: {}]   ;;  %s1336_s5 = inlined_call_operand.vmem [shape: f32[1,1000], index: 5, kind: input, shape index: {}]   ;;  %s1337_s6 = inlined_call_operand.hbm [shape: bf16[16,1000], index: 6, kind: output, shape index: {0}]   ;;  %s1338_s7 = inlined_call_operand.hbm [shape: bf16[16,1000], index: 7, kind: output, shape index: {1}]  }
   0x1   :  { %14 = vsyncpa [#allocation6], 0 }
   0x2   :  { %15 = vsyncpa [#allocation9], 0 }
   0x3   :  { %16 = vsyncpa [#allocation4], 0 }
   0x4   :  { %17 = vsyncpa [#allocation12], 0  ;;  %s1103_s24 = smov [#allocation5]   ;;  %s1104_s26 = smov [#allocation2]  }
   0x5   :  { %s35_s25 = sshll.u32 %s1103_s24, 4  ;;  %s23_s27 = sshll.u32 %s1104_s26, 4  ;;  %s36_s25 = int_to_ptr.vmem [resolvable:$true] %s35_s25  ;;  %s1154_s27 = int_to_ptr.vmem [resolvable:$true] %s23_s27 }
   0x6   :  { %s961_s30 = scalar_lea.hbm %s1332_s1, 128 }
   0x7   :  { %p962_p0 = scmp.ne.s32.totalorder %s1332_s1, %s961_s30  ;;  %p965_p1 = scmp.lt.u32.totalorder %s961_s30, %s1332_s1 }
   0x9   :  { %p967_p2 = pnand %p965_p1, %p962_p0 }
   0xb   :  { %970 = shalt.err (!%p967_p2)
}
   0xc   :  { %s971_s12 = scalar_lea.vmem %s36_s25, 128  ;;  %p976_p4 = scmp.lt.s32.totalorder %s36_s25, %s36_s25 }
   0xd   :  { %p972_p3 = scmp.ne.s32.totalorder %s36_s25, %s971_s12  ;;  %p977_p5 = scmp.lt.s32.totalorder %s971_s12, %s971_s12 }
   0xf   :  { %p978_p6 = por %p977_p5, %p976_p4 }
  0x11   :  { %p979_p7 = pnand %p978_p6, %p972_p3 }
  0x13   :  { %982 = shalt.err (!%p979_p7)
}
  0x14   :  { %s1105_s13 = smov 64   ;;  %s1106_s14 = smov 4  }
  0x15   :  { %41 = dma.hbm_to_vmem [thread:$0]  %s1332_s1, 128, %s36_s25, [#allocation6], %s1105_s13, %s1105_s13, %s1106_s14  }
  0x16   :  { %s983_s19 = scalar_lea.hbm %s1331_s0, 128 }
  0x17   :  { %p984_p8 = scmp.ne.s32.totalorder %s1331_s0, %s983_s19  ;;  %p987_p9 = scmp.lt.u32.totalorder %s983_s19, %s1331_s0 }
  0x19   :  { %p989_p10 = pnand %p987_p9, %p984_p8 }
  0x1b   :  { %992 = shalt.err (!%p989_p10)
}
  0x1c   :  { %s993_s24 = scalar_lea.vmem %s1154_s27, 128  ;;  %p998_p12 = scmp.lt.s32.totalorder %s1154_s27, %s1154_s27 }
  0x1d   :  { %p994_p11 = scmp.ne.s32.totalorder %s1154_s27, %s993_s24  ;;  %p999_p13 = scmp.lt.s32.totalorder %s993_s24, %s993_s24 }
  0x1f   :  { %p1000_p0 = por %p999_p13, %p998_p12 }
  0x21   :  { %p1001_p1 = pnand %p1000_p0, %p994_p11 }
  0x23   :  { %1004 = shalt.err (!%p1001_p1)
}
  0x24   :  { %29 = dma.hbm_to_vmem [thread:$0]  %s1331_s0, 128, %s1154_s27, [#allocation3], %s1105_s13, %s1105_s13, %s1106_s14  }
  0x25   :  { %s1107_s26 = smov [#allocation7]   ;;  %s1005_s8 = scalar_lea.hbm %s1333_s2, 2048 }
  0x26   :  { %s47_s28 = sshll.u32 %s1107_s26, 4  ;;  %p1006_p2 = scmp.ne.s32.totalorder %s1333_s2, %s1005_s8  ;;  %s48_s28 = int_to_ptr.vmem [resolvable:$true] %s47_s28 }
  0x27   :  { %p1009_p3 = scmp.lt.u32.totalorder %s1005_s8, %s1333_s2 }
  0x29   :  { %p1011_p4 = pnand %p1009_p3, %p1006_p2 }
  0x2b   :  { %1014 = shalt.err (!%p1011_p4)
}
  0x2c   :  { %s1015_s15 = scalar_lea.vmem %s48_s28, 2048  ;;  %p1020_p6 = scmp.lt.s32.totalorder %s48_s28, %s48_s28 }
  0x2d   :  { %p1016_p5 = scmp.ne.s32.totalorder %s48_s28, %s1015_s15  ;;  %p1021_p7 = scmp.lt.s32.totalorder %s1015_s15, %s1015_s15 }
  0x2f   :  { %p1022_p8 = por %p1021_p7, %p1020_p6 }
  0x31   :  { %p1023_p9 = pnand %p1022_p8, %p1016_p5 }
  0x33   :  { %1026 = shalt.err (!%p1023_p9)
}
  0x34   :  { %s1108_s0 = smov 512   ;;  %s1109_s27 = smov 32  }
  0x35   :  { %53 = dma.hbm_to_vmem [thread:$0]  %s1333_s2, 2048, %s48_s28, [#allocation6], %s1108_s0, %s1108_s0, %s1109_s27  }
  0x36   :  { %s1110_s16 = smov [#allocation8]   ;;  %s1027_s20 = scalar_lea.hbm %s1334_s3, 2048 }
  0x37   :  { %s59_s17 = sshll.u32 %s1110_s16, 4  ;;  %p1028_p10 = scmp.ne.s32.totalorder %s1334_s3, %s1027_s20  ;;  %s60_s17 = int_to_ptr.vmem [resolvable:$true] %s59_s17 }
  0x38   :  { %p1031_p11 = scmp.lt.u32.totalorder %s1027_s20, %s1334_s3 }
  0x3a   :  { %p1033_p12 = pnand %p1031_p11, %p1028_p10 }
  0x3c   :  { %1036 = shalt.err (!%p1033_p12)
}
  0x3d   :  { %s1037_s1 = scalar_lea.vmem %s60_s17, 2048  ;;  %p1042_p0 = scmp.lt.s32.totalorder %s60_s17, %s60_s17 }
  0x3e   :  { %p1038_p13 = scmp.ne.s32.totalorder %s60_s17, %s1037_s1  ;;  %p1043_p1 = scmp.lt.s32.totalorder %s1037_s1, %s1037_s1 }
  0x40   :  { %p1044_p2 = por %p1043_p1, %p1042_p0 }
  0x42   :  { %p1045_p3 = pnand %p1044_p2, %p1038_p13 }
  0x44   :  { %1048 = shalt.err (!%p1045_p3)
}
  0x45   :  { %65 = dma.hbm_to_vmem [thread:$0]  %s1334_s3, 2048, %s60_s17, [#allocation9], %s1108_s0, %s1108_s0, %s1109_s27  }
  0x46   :  { %1093 = dma.done.wait [#allocation3], 128  }
  0x47   :  { %1094 = vsyncadd [#allocation3], 4294967168 }
  0x48   :  { %1095 = dma.done.wait [#allocation6], 2176  }
  0x49   :  { %1096 = vsyncadd [#allocation6], 4294965120 }
  0x4a   :  { %1097 = dma.done.wait [#allocation9], 2048  }
  0x4b   :  { %1098 = vsyncadd [#allocation9], 4294965248  ;;  %v1111_v0 = vmov 0   ;;  %v85_v1 = vld [vmem:[#allocation7] sm:$0xff]  ;;  %v86_v3 = vld [vmem:[#allocation7 + $0x8] sm:$0xff]  ;;  %vm228_vm0 = vcmask 261120  }
  0x4c   :  { %264 = vmatprep.mubr.bf16.mxu0 %v1111_v0  ;;  %307 = vmatprep.mubr.bf16.mxu1 %v1111_v0  ;;  %v89_v2 = vld [vmem:[#allocation7 + $0x20] sm:$0xff]  ;;  %v90_v5 = vld [vmem:[#allocation7 + $0x28] sm:$0xff]  ;;  %v87_v15 = vld [vmem:[#allocation7 + $0x10] sm:$0xff]  ;;  %vm455_vm1 = vcmask 1043456   ;;  %vm456_vm2 = vcmask 850948   ;;  %s1112_s29 = smov [#allocation10]  }
  0x4d   :  { %v876_v4 = vcombine.high %v85_v1, %v89_v2  ;;  %v875_v6 = vcombine.low %v85_v1, %v89_v2  ;;  %v93_v7 = vld [vmem:[#allocation7 + $0x40] sm:$0xff]  ;;  %v878_v9 = vcombine.high %v86_v3, %v90_v5  ;;  %v877_v10 = vcombine.low %v86_v3, %v90_v5  ;;  %v94_v12 = vld [vmem:[#allocation7 + $0x48] sm:$0xff]  ;;  %v91_v17 = vld [vmem:[#allocation7 + $0x30] sm:$0xff]  ;;  %s844_s30 = sshll.u32 %s1112_s29, 4  ;;  %s845_s30 = int_to_ptr.vmem [resolvable:$true] %s844_s30 }
  0x4e   :  { %v97_v8 = vld [vmem:[#allocation7 + $0x60] sm:$0xff]  ;;  %v98_v13 = vld [vmem:[#allocation7 + $0x68] sm:$0xff]  ;;  %v88_v18 = vld [vmem:[#allocation7 + $0x18] sm:$0xff]  ;;  %v880_v21 = vcombine.high %v87_v15, %v91_v17  ;;  %v879_v28 = vcombine.low %v87_v15, %v91_v17  ;;  %p1054_p5 = scmp.lt.s32.totalorder %s845_s30, %s845_s30 }
  0x4f   :  { %v884_v11 = vcombine.high %v93_v7, %v97_v8  ;;  %232 = vmatprep.subr.bf16.mxu0 %v876_v4  ;;  %v886_v14 = vcombine.high %v94_v12, %v98_v13  ;;  %275 = vmatprep.subr.bf16.mxu1 %v878_v9  ;;  %v883_v16 = vcombine.low %v93_v7, %v97_v8  ;;  %v92_v19 = vld [vmem:[#allocation7 + $0x38] sm:$0xff]  ;;  %v95_v23 = vld [vmem:[#allocation7 + $0x50] sm:$0xff]  ;;  %v465_v32 = vld [vmem:[#allocation8] sm:$0xff]  ;;  %v103_v4 = vlaneseq }
  0x50   :  { %233 = vmatpush1.bf16.msra.mxu0 %v875_v6  ;;  %276 = vmatpush1.bf16.msra.mxu1 %v877_v10  ;;  %v885_v20 = vcombine.low %v94_v12, %v98_v13  ;;  %v882_v22 = vcombine.high %v88_v18, %v92_v19  ;;  %v99_v24 = vld [vmem:[#allocation7 + $0x70] sm:$0xff]  ;;  %v96_v26 = vld [vmem:[#allocation7 + $0x58] sm:$0xff]  ;;  %v881_v29 = vcombine.low %v88_v18, %v92_v19  ;;  %v469_v33 = vld [vmem:[#allocation8 + $0x20] sm:$0xff] }
  0x51   :  { %234 = vmatprep.subr.bf16.mxu0 %v884_v11  ;;  %277 = vmatprep.subr.bf16.mxu1 %v886_v14  ;;  %v959_v25 = vld [vmem:[#allocation2] sm:$0xff]   ;;  %v100_v27 = vld [vmem:[#allocation7 + $0x78] sm:$0xff]  ;;  %v888_v30 = vcombine.high %v95_v23, %v99_v24  ;;  %v466_v34 = vld [vmem:[#allocation8 + $0x8] sm:$0xff]  ;;  %v887_v36 = vcombine.low %v95_v23, %v99_v24  ;;  %v905_v38 = vcombine.high %v465_v32, %v469_v33  ;;  %v1231_v5 = vshrl.u32 %v103_v4, 7 }
  0x52   :  { %v890_v31 = vcombine.high %v96_v26, %v100_v27  ;;  %v470_v35 = vld [vmem:[#allocation8 + $0x28] sm:$0xff]  ;;  %v889_v37 = vcombine.low %v96_v26, %v100_v27  ;;  %v473_v40 = vld [vmem:[#allocation8 + $0x40] sm:$0xff]  ;;  %v904_v44 = vcombine.low %v465_v32, %v469_v33  ;;  %v467_v48 = vld [vmem:[#allocation8 + $0x10] sm:$0xff] }
  0x53   :  { %v907_v39 = vcombine.high %v466_v34, %v470_v35  ;;  %v477_v41 = vld [vmem:[#allocation8 + $0x60] sm:$0xff]  ;;  %v474_v42 = vld [vmem:[#allocation8 + $0x48] sm:$0xff]  ;;  %v906_v45 = vcombine.low %v466_v34, %v470_v35  ;;  %v471_v49 = vld [vmem:[#allocation8 + $0x30] sm:$0xff]  ;;  %v105_v6 = vsub.s32 0, %v1231_v5  ;;  %v113_v8 = vsub.s32 2, %v1231_v5 }
  0x54   :  { %235 = vmatpush1.bf16.msra.mxu0 %v883_v16  ;;  %278 = vmatpush1.bf16.msra.mxu1 %v885_v20  ;;  %v478_v43 = vld [vmem:[#allocation8 + $0x68] sm:$0xff]  ;;  %v913_v46 = vcombine.high %v473_v40, %v477_v41  ;;  %v468_v50 = vld [vmem:[#allocation8 + $0x18] sm:$0xff]  ;;  %v912_v52 = vcombine.low %v473_v40, %v477_v41  ;;  %v909_v54 = vcombine.high %v467_v48, %v471_v49  ;;  %v475_v56 = vld [vmem:[#allocation8 + $0x50] sm:$0xff]  ;;  %v109_v9 = vsub.s32 1, %v1231_v5 }
  0x55   :  { %318 = vmatprep.subr.bf16.mxu0 %v880_v21  ;;  %361 = vmatprep.subr.bf16.mxu1 %v882_v22  ;;  %v915_v47 = vcombine.high %v474_v42, %v478_v43  ;;  %v472_v51 = vld [vmem:[#allocation8 + $0x38] sm:$0xff]  ;;  %v914_v53 = vcombine.low %v474_v42, %v478_v43  ;;  %v479_v57 = vld [vmem:[#allocation8 + $0x70] sm:$0xff]  ;;  %v908_v61 = vcombine.low %v467_v48, %v471_v49  ;;  %v121_v18 = vsub.s32 4, %v1231_v5  ;;  %vm1265_vm3 = vmor %vm456_vm2, %vm455_vm1 }
  0x56   :  { %v911_v55 = vcombine.high %v468_v50, %v472_v51  ;;  %v960_v58 = vld [vmem:[#allocation5] sm:$0xff]   ;;  %v910_v62 = vcombine.low %v468_v50, %v472_v51  ;;  %v917_v63 = vcombine.high %v475_v56, %v479_v57  ;;  %v916_v2 = vcombine.low %v475_v56, %v479_v57  ;;  %v101_v7 = vld [vmem:[%s1335_s4] sm:$0xff] }
  0x57   :  { %891 = vmatmul.mubr.msk.bf16.vlgmr.msra.gmra.mrb[0].mxu0 %vm228_vm0, %v959_v25  ;;  %892 = vmatmul.mubr.msk.bf16.vlgmr.msra.gmra.mrb[0].mxu1 %vm228_vm0, %v959_v25  ;;  %v476_v59 = vld [vmem:[#allocation8 + $0x58] sm:$0xff]  ;;  %v106_v10 = vrot.slane %v101_v7, %v105_v6  ;;  %v114_v11 = vrot.slane %v101_v7, %v113_v8  ;;  %v110_v12 = vrot.slane %v101_v7, %v109_v9  ;;  %v129_v23 = vsub.s32 6, %v1231_v5  ;;  %v1263_v50 = vld [vmem:[%s1336_s5] sm:$0xff]  ;;  %s1049_s5 = scalar_lea.vmem %s845_s30, 1024 }
  0x58   :  { %319 = vmatpush1.bf16.msra.mxu0 %v879_v28  ;;  %362 = vmatpush1.bf16.msra.mxu1 %v881_v29  ;;  %v480_v60 = vld [vmem:[#allocation8 + $0x78] sm:$0xff]  ;;  %v125_v24 = vsub.s32 5, %v1231_v5  ;;  %v133_v29 = vsub.s32 7, %v1231_v5  ;;  %p1050_p4 = scmp.ne.s32.totalorder %s845_s30, %s1049_s5  ;;  %p1055_p6 = scmp.lt.s32.totalorder %s1049_s5, %s1049_s5 }
  0x59   :  { %320 = vmatprep.subr.bf16.mxu0 %v888_v30  ;;  %363 = vmatprep.subr.bf16.mxu1 %v890_v31  ;;  %v919_v1 = vcombine.high %v476_v59, %v480_v60  ;;  %v918_v3 = vcombine.low %v476_v59, %v480_v60 }
  0x5a   :  { %350 = vmatprep.mubr.bf16.mxu0 %v1111_v0  ;;  %393 = vmatprep.mubr.bf16.mxu1 %v1111_v0  ;;  %v134_v41 = vrot.slane %v101_v7, %v133_v29  ;;  %p1056_p7 = por %p1055_p6, %p1054_p5 }
  0x5c   :  { %321 = vmatpush1.bf16.msra.mxu0 %v887_v36  ;;  %364 = vmatpush1.bf16.msra.mxu1 %v889_v37  ;;  %v122_v36 = vrot.slane %v101_v7, %v121_v18  ;;  %p1057_p8 = pnand %p1056_p7, %p1050_p4 }
  0x5d   :  { %611 = vmatprep.subr.bf16.mxu0 %v905_v38  ;;  %654 = vmatprep.subr.bf16.mxu1 %v907_v39  ;;  %v130_v38 = vrot.slane %v101_v7, %v129_v23  ;;  %v126_v39 = vrot.slane %v101_v7, %v125_v24 }
  0x5f   :  { %893 = vmatmul.mubr.msk.bf16.vlgmr.msra.gmra.mrb[4].mxu0 %vm228_vm0, %v959_v25  ;;  %894 = vmatmul.mubr.msk.bf16.vlgmr.msra.gmra.mrb[4].mxu1 %vm228_vm0, %v959_v25 }
  0x60   :  { %612 = vmatpush1.bf16.msra.mxu0 %v904_v44  ;;  %655 = vmatpush1.bf16.msra.mxu1 %v906_v45 }
  0x61   :  { %613 = vmatprep.subr.bf16.mxu0 %v913_v46  ;;  %656 = vmatprep.subr.bf16.mxu1 %v915_v47 }
  0x62   :  { %643 = vmatprep.mubr.bf16.mxu0 %v1111_v0  ;;  %686 = vmatprep.mubr.bf16.mxu1 %v1111_v0 }
  0x64   :  { %614 = vmatpush1.bf16.msra.mxu0 %v912_v52  ;;  %657 = vmatpush1.bf16.msra.mxu1 %v914_v53 }
  0x65   :  { %697 = vmatprep.subr.bf16.mxu0 %v909_v54  ;;  %740 = vmatprep.subr.bf16.mxu1 %v911_v55 }
  0x67   :  { %920 = vmatmul.mubr.msk.bf16.vlgmr.msra.gmra.mrb[8].mxu0 %vm228_vm0, %v960_v58  ;;  %921 = vmatmul.mubr.msk.bf16.vlgmr.msra.gmra.mrb[8].mxu1 %vm228_vm0, %v960_v58 }
  0x68   :  { %698 = vmatpush1.bf16.msra.mxu0 %v908_v61  ;;  %741 = vmatpush1.bf16.msra.mxu1 %v910_v62  ;;  %v486_v62 = vrot.slane %v1263_v50, %v105_v6 }
  0x69   :  { %699 = vmatprep.subr.bf16.mxu0 %v917_v63  ;;  %742 = vmatprep.subr.bf16.mxu1 %v919_v1  ;;  %v494_v1 = vrot.slane %v1263_v50, %v113_v8 }
  0x6a   :  { %729 = vmatprep.mubr.bf16.mxu0 %v1111_v0  ;;  %772 = vmatprep.mubr.bf16.mxu1 %v1111_v0  ;;  %v117_v0 = vsub.s32 3, %v1231_v5 }
  0x6c   :  { %700 = vmatpush1.bf16.msra.mxu0 %v916_v2  ;;  %743 = vmatpush1.bf16.msra.mxu1 %v918_v3  ;;  %v118_v13 = vrot.slane %v101_v7, %v117_v0  ;;  %v490_v2 = vrot.slane %v1263_v50, %v109_v9  ;;  %v498_v4 = vrot.slane %v1263_v50, %v117_v0 }
  0x6f   :  { %922 = vmatmul.mubr.msk.bf16.vlgmr.msra.gmra.mrb[12].mxu0 %vm228_vm0, %v960_v58  ;;  %923 = vmatmul.mubr.msk.bf16.vlgmr.msra.gmra.mrb[12].mxu1 %vm228_vm0, %v960_v58 }
 0x12a   :  { %v266_v14 = vpop.f32.mrb[0].mxu0  ;;  %v309_v16 = vpop.f32.mrb[0].mxu1 }
 0x12b   :  { %v267_v15 = vadd.f32 %v266_v14, %v106_v10  ;;  %v268_v17 = vpop.f32.mrb[1].mxu0  ;;  %v310_v19 = vadd.f32 %v309_v16, %v114_v11  ;;  %v311_v21 = vpop.f32.mrb[1].mxu1 }
 0x12c   :  { %v269_v20 = vadd.f32 %v268_v17, %v110_v12  ;;  %v270_v22 = vpop.f32.mrb[2].mxu0  ;;  %v312_v25 = vadd.f32 %v311_v21, %v118_v13  ;;  %v313_v27 = vpop.f32.mrb[2].mxu1 }
 0x12d   :  { %v271_v26 = vadd.f32 %v270_v22, %v106_v10  ;;  %v272_v28 = vpop.f32.mrb[3].mxu0  ;;  %v314_v31 = vadd.f32 %v313_v27, %v114_v11  ;;  %v315_v33 = vpop.f32.mrb[3].mxu1 }
 0x12e   :  { %v932_v30 = vpack.c.bf16 %v269_v20, %v267_v15  ;;  %v273_v32 = vadd.f32 %v272_v28, %v110_v12  ;;  %v933_v34 = vpack.c.bf16 %v312_v25, %v310_v19  ;;  %v316_v35 = vadd.f32 %v315_v33, %v118_v13 }
 0x130   :  { %452 = vst [vmem:[#allocation10] sm:$0xff] %v932_v30  ;;  %v936_v37 = vpack.c.bf16 %v273_v32, %v271_v26  ;;  %453 = vst [vmem:[#allocation10 + $0x8] sm:$0xff] %v933_v34  ;;  %v937_v40 = vpack.c.bf16 %v316_v35, %v314_v31 }
 0x132   :  { %459 = vst [vmem:[#allocation10 + $0x20] sm:$0xff] %v936_v37  ;;  %v352_v42 = vpop.f32.mrb[4].mxu0  ;;  %460 = vst [vmem:[#allocation10 + $0x28] sm:$0xff] %v937_v40  ;;  %v395_v44 = vpop.f32.mrb[4].mxu1 }
 0x133   :  { %v353_v43 = vadd.f32 %v352_v42, %v122_v36  ;;  %v354_v45 = vpop.f32.mrb[5].mxu0  ;;  %v396_v46 = vadd.f32 %v395_v44, %v130_v38  ;;  %v397_v48 = vpop.f32.mrb[5].mxu1 }
 0x134   :  { %v355_v47 = vadd.f32 %v354_v45, %v126_v39  ;;  %v356_v49 = vpop.f32.mrb[6].mxu0  ;;  %v398_v51 = vadd.f32 %v397_v48, %v134_v41  ;;  %v399_v53 = vpop.f32.mrb[6].mxu1 }
 0x135   :  { %v357_v52 = vadd.f32 %v356_v49, %v122_v36  ;;  %v358_v54 = vpop.f32.mrb[7].mxu0  ;;  %v400_v57 = vadd.f32 %v399_v53, %v130_v38  ;;  %v401_v59 = vpop.f32.mrb[7].mxu1 }
 0x136   :  { %v934_v55 = vpack.c.bf16 %v355_v47, %v353_v43  ;;  %v359_v58 = vadd.f32 %v358_v54, %v126_v39  ;;  %v935_v60 = vpack.c.bf16 %v398_v51, %v396_v46  ;;  %v402_v61 = vadd.f32 %v401_v59, %v134_v41 }
 0x138   :  { %454 = vst [vmem:[#allocation10 + $0x10] sm:$0xff] %v934_v55  ;;  %v938_v63 = vpack.c.bf16 %v359_v58, %v357_v52  ;;  %458 = vst.msk [vmem:[#allocation10 + $0x18] sm:$0xff] %vm1265_vm3, %v935_v60  ;;  %v939_v3 = vpack.c.bf16 %v402_v61, %v400_v57 }
 0x13a   :  { %461 = vst [vmem:[#allocation10 + $0x30] sm:$0xff] %v938_v63  ;;  %v645_v6 = vpop.f32.mrb[8].mxu0  ;;  %462 = vst.msk [vmem:[#allocation10 + $0x38] sm:$0xff] %vm1265_vm3, %v939_v3  ;;  %v688_v8 = vpop.f32.mrb[8].mxu1 }
 0x13b   :  { %v646_v7 = vadd.f32 %v645_v6, %v486_v62  ;;  %v647_v10 = vpop.f32.mrb[9].mxu0  ;;  %v689_v11 = vadd.f32 %v688_v8, %v494_v1  ;;  %v690_v9 = vpop.f32.mrb[9].mxu1 }
 0x13c   :  { %v648_v12 = vadd.f32 %v647_v10, %v490_v2  ;;  %v649_v13 = vpop.f32.mrb[10].mxu0 }
 0x13d   :  { %1060 = shalt.err (!%p1057_p8)
}
 0x13e   :  { %s1061_s10 = scalar_lea.hbm %s1337_s6, 1024 }
 0x13f   :  { %p1062_p9 = scmp.ne.s32.totalorder %s1337_s6, %s1061_s10  ;;  %p1065_p10 = scmp.lt.u32.totalorder %s1061_s10, %s1337_s6 }
 0x141   :  { %p1067_p11 = pnand %p1065_p10, %p1062_p9 }
 0x143   :  { %1070 = shalt.err (!%p1067_p11)
}
 0x144   :  { %850 = dma.vmem_to_hbm [thread:$0]  %s845_s30, 1024, %s1337_s6, [#allocation4], %s1108_s0, %s1108_s0, %s1109_s27   ;;  %v691_v0 = vadd.f32 %v690_v9, %v498_v4  ;;  %v650_v14 = vadd.f32 %v649_v13, %v486_v62  ;;  %v692_v15 = vpop.f32.mrb[10].mxu1  ;;  %v651_v16 = vpop.f32.mrb[11].mxu0  ;;  %v940_v17 = vpack.c.bf16 %v648_v12, %v646_v7  ;;  %v502_v26 = vrot.slane %v1263_v50, %v121_v18 }
 0x145   :  { %v693_v19 = vadd.f32 %v692_v15, %v494_v1  ;;  %v652_v20 = vadd.f32 %v651_v16, %v490_v2  ;;  %v694_v21 = vpop.f32.mrb[11].mxu1  ;;  %v510_v28 = vrot.slane %v1263_v50, %v129_v23  ;;  %v506_v30 = vrot.slane %v1263_v50, %v125_v24  ;;  %v731_v33 = vpop.f32.mrb[12].mxu0  ;;  %s1113_s6 = smov [#allocation11]  }
 0x146   :  { %v941_v22 = vpack.c.bf16 %v691_v0, %v689_v11  ;;  %v695_v25 = vadd.f32 %v694_v21, %v498_v4  ;;  %831 = vst [vmem:[#allocation11] sm:$0xff] %v940_v17  ;;  %v514_v32 = vrot.slane %v1263_v50, %v133_v29  ;;  %v732_v18 = vadd.f32 %v731_v33, %v502_v26  ;;  %v774_v34 = vpop.f32.mrb[12].mxu1  ;;  %v733_v35 = vpop.f32.mrb[13].mxu0  ;;  %s856_s17 = sshll.u32 %s1113_s6, 4  ;;  %s857_s17 = int_to_ptr.vmem [resolvable:$true] %s856_s17 }
 0x147   :  { %v944_v27 = vpack.c.bf16 %v652_v20, %v650_v14  ;;  %v775_v36 = vadd.f32 %v774_v34, %v510_v28  ;;  %v734_v37 = vadd.f32 %v733_v35, %v506_v30  ;;  %v776_v38 = vpop.f32.mrb[13].mxu1  ;;  %v735_v23 = vpop.f32.mrb[14].mxu0  ;;  %s1071_s18 = scalar_lea.vmem %s857_s17, 1024  ;;  %p1076_p13 = scmp.lt.s32.totalorder %s857_s17, %s857_s17 }
 0x148   :  { %832 = vst [vmem:[#allocation11 + $0x8] sm:$0xff] %v941_v22  ;;  %v945_v31 = vpack.c.bf16 %v695_v25, %v693_v19  ;;  %v777_v39 = vadd.f32 %v776_v38, %v514_v32  ;;  %v736_v40 = vadd.f32 %v735_v23, %v502_v26  ;;  %v778_v41 = vpop.f32.mrb[14].mxu1  ;;  %v737_v24 = vpop.f32.mrb[15].mxu0  ;;  %p1072_p12 = scmp.ne.s32.totalorder %s857_s17, %s1071_s18  ;;  %p1077_p0 = scmp.lt.s32.totalorder %s1071_s18, %s1071_s18 }
 0x149   :  { %835 = vst [vmem:[#allocation11 + $0x20] sm:$0xff] %v944_v27  ;;  %v942_v42 = vpack.c.bf16 %v734_v37, %v732_v18  ;;  %v779_v43 = vadd.f32 %v778_v41, %v510_v28  ;;  %v738_v44 = vadd.f32 %v737_v24, %v506_v30  ;;  %v780_v5 = vpop.f32.mrb[15].mxu1 }
 0x14a   :  { %836 = vst [vmem:[#allocation11 + $0x28] sm:$0xff] %v945_v31  ;;  %v943_v29 = vpack.c.bf16 %v777_v39, %v775_v36  ;;  %v781_v45 = vadd.f32 %v780_v5, %v514_v32  ;;  %p1078_p1 = por %p1077_p0, %p1076_p13 }
 0x14b   :  { %833 = vst [vmem:[#allocation11 + $0x10] sm:$0xff] %v942_v42  ;;  %v946_v46 = vpack.c.bf16 %v738_v44, %v736_v40 }
 0x14c   :  { %834 = vst.msk [vmem:[#allocation11 + $0x18] sm:$0xff] %vm1265_vm3, %v943_v29  ;;  %v947_v47 = vpack.c.bf16 %v781_v45, %v779_v43  ;;  %p1079_p2 = pnand %p1078_p1, %p1072_p12 }
 0x14d   :  { %837 = vst [vmem:[#allocation11 + $0x30] sm:$0xff] %v946_v46 }
 0x14e   :  { %838 = vst.msk [vmem:[#allocation11 + $0x38] sm:$0xff] %vm1265_vm3, %v947_v47 }
 0x14f   :  { %1082 = shalt.err (!%p1079_p2)
}
 0x150   :  { %s1083_s21 = scalar_lea.hbm %s1338_s7, 1024 }
 0x151   :  { %p1084_p3 = scmp.ne.s32.totalorder %s1338_s7, %s1083_s21  ;;  %p1087_p4 = scmp.lt.u32.totalorder %s1083_s21, %s1338_s7 }
 0x153   :  { %p1089_p5 = pnand %p1087_p4, %p1084_p3 }
 0x155   :  { %1092 = shalt.err (!%p1089_p5)
}
 0x156   :  { %862 = dma.vmem_to_hbm [thread:$0]  %s857_s17, 1024, %s1338_s7, [#allocation12], %s1108_s0, %s1108_s0, %s1109_s27  }
 0x157   :  { %1099 = dma.done.wait [#allocation4], 1024  }
 0x158   :  { %1100 = vsyncadd [#allocation4], 4294966272 }
 0x159   :  { %1101 = dma.done.wait [#allocation12], 1024  }
 0x15a   :  { %1102 = vsyncadd [#allocation12], 4294966272 }
 0x15b   :  { %869 = vsyncpa [#allocation3], 1 }
 0x15c   :  { %870 = vsyncpa [#allocation6], 1 }
 0x15d   :  { %871 = vsyncpa [#allocation9], 1 }
 0x15e   :  { %872 = vsyncpa [#allocation4], 1 }
 0x15f   :  { %873 = vsyncpa [#allocation12], 1 }

</bundles_post_ra>
